<compile_context>
chip_gen: v5e
topology: v5e:2x2
jax: 0.10.0
libtpu: 0.0.40
codegen_flags: <defaults>
</compile_context>

<pallas_src>
import functools

import jax
import jax.numpy as jnp
from jax.experimental import pallas as pl
from jax.experimental.pallas import tpu as pltpu

ENC_DIM = 69   # fixed by the PyTorch module (enc1 in / dec3 out)
H1 = 100
H2 = 50
LANE = 128     # TPU lane width
HALF = LANE // 2


def _round_up(x, m):
    return (x + m - 1) // m * m


# --------------------------------------------------------------------------- #
# Kernel
# --------------------------------------------------------------------------- #
def vae_kernel(x_ref, eps_ref,
               w1_ref, b1_ref, w2_ref, b2_ref, w3_ref, b3_ref,
               w4_ref, b4_ref, w5_ref, b5_ref, w6_ref, b6_ref,
               out_ref):
    """One row tile of the VAE forward pass (all feature dims pre-padded to 128).

    x_ref   : (TN, 128)  bf16  input rows   (valid lanes 0:69)
    eps_ref : (TN, 128)  bf16  noise        (valid lanes 0:F, zeros elsewhere)
    w*_ref  : bf16 zero-padded weights, b*_ref f32 zero-padded biases
    out_ref : (TN, 256)  bf16  [ rec_pad(128) | head_pad(128) ]
              head lanes: mu at [0:F], log_var at [64:64+F]
    """
    f32, bf16 = jnp.float32, jnp.bfloat16

    # ---------------- encoder ----------------
    h = jnp.dot(x_ref[...], w1_ref[...], preferred_element_type=f32) + b1_ref[...]
    h = jnp.maximum(h, 0.0)                                           # (TN, 128) f32
    h = jnp.dot(h.astype(bf16), w2_ref[...], preferred_element_type=f32) + b2_ref[...]
    h = jnp.maximum(h, 0.0)                                           # (TN, 128) f32

    # Packed head: mu in lanes [0:F], log_var in lanes [64:64+F], zeros elsewhere.
    head = jnp.dot(h.astype(bf16), w3_ref[...], preferred_element_type=f32) + b3_ref[...]

    # Half-lane rotation brings log_var onto lanes [0:F].  A shift of 64 on a
    # 128-lane vector is direction-agnostic, so there is no rotate-sign ambiguity.
    lv_aligned = pltpu.roll(head, shift=HALF, axis=1)                 # (TN, 128) f32

    # ------------- reparameterize: z = mu + eps * exp(0.5 * log_var) -------------
    # eps is zero on lanes >= F, so padded lanes of z only carry head values
    # (log_var at lanes [64:64+F]); those are annihilated by dec1's zero rows >= F.
    z = head + eps_ref[...].astype(f32) * jnp.exp(0.5 * lv_aligned)   # (TN, 128) f32

    # ---------------- decoder ----------------
    d = jnp.dot(z.astype(bf16), w4_ref[...], preferred_element_type=f32) + b4_ref[...]
    d = jnp.maximum(d, 0.0)
    d = jnp.dot(d.astype(bf16), w5_ref[...], preferred_element_type=f32) + b5_ref[...]
    d = jnp.maximum(d, 0.0)
    rec = jnp.dot(d.astype(bf16), w6_ref[...], preferred_element_type=f32) + b6_ref[...]

    # Lane-dense output slab: two 128-aligned, unmasked bf16 stores.
    out_ref[:, 0:LANE] = rec.astype(bf16)
    out_ref[:, LANE:2 * LANE] = head.astype(bf16)


# --------------------------------------------------------------------------- #
# Parameter construction (PyTorch nn.Linear default init) + padding/packing
# --------------------------------------------------------------------------- #
def init_linear(key, in_features, out_features):
    kw, kb = jax.random.split(key)
    bound = 1.0 / jnp.sqrt(jnp.float32(in_features))
    w = jax.random.uniform(kw, (in_features, out_features), jnp.float32, -bound, bound)
    b = jax.random.uniform(kb, (out_features,), jnp.float32, -bound, bound)
    return w, b


def make_params(key, features_dim):
    keys = jax.random.split(key, 6)
    return dict(
        enc1=init_linear(keys[0], ENC_DIM, H1),
        enc2=init_linear(keys[1], H1, H2),
        enc3=init_linear(keys[2], H2, 2 * features_dim),
        dec1=init_linear(keys[3], features_dim, H2),
        dec2=init_linear(keys[4], H2, H1),
        dec3=init_linear(keys[5], H1, ENC_DIM),
    )


def _pad_wb(w, b, in_pad, out_pad):
    wp = jnp.zeros((in_pad, out_pad), jnp.float32).at[:w.shape[0], :w.shape[1]].set(w)
    bp = jnp.zeros((1, out_pad), jnp.float32).at[0, :b.shape[0]].set(b)
    return wp.astype(jnp.bfloat16), bp


def prepare_padded_params(params, features_dim):
    """Pad every weight to 128-lane-aligned shapes.  The enc3 mu/log_var heads are
    packed into ONE (128, 128) weight: mu columns at lanes [0:F], log_var columns at
    lanes [64:64+F].  Invariant: dec1 (w4) rows >= F are exactly zero so the non-zero
    garbage in z's padded lanes is annihilated."""
    f = features_dim
    assert f <= HALF, "head packing requires features_dim <= 64"
    w1, b1 = _pad_wb(*params["enc1"], LANE, LANE)
    w2, b2 = _pad_wb(*params["enc2"], LANE, LANE)

    w3, b3 = params["enc3"]                     # (50, 2F), (2F,)
    w3p = jnp.zeros((LANE, LANE), jnp.float32)
    w3p = w3p.at[:H2, :f].set(w3[:, :f])                    # mu head   -> lanes [0:F]
    w3p = w3p.at[:H2, HALF:HALF + f].set(w3[:, f:])         # log_var   -> lanes [64:64+F]
    b3p = jnp.zeros((1, LANE), jnp.float32)
    b3p = b3p.at[0, :f].set(b3[:f]).at[0, HALF:HALF + f].set(b3[f:])

    w4, b4 = _pad_wb(*params["dec1"], LANE, LANE)           # rows >= F stay zero
    w5, b5 = _pad_wb(*params["dec2"], LANE, LANE)
    w6, b6 = _pad_wb(*params["dec3"], LANE, LANE)
    return (w1, b1, w2, b2, w3p.astype(jnp.bfloat16), b3p, w4, b4, w5, b5, w6, b6)


# --------------------------------------------------------------------------- #
# Wrapper
# --------------------------------------------------------------------------- #
@functools.partial(jax.jit, static_argnames=("features_dim", "tile_n"))
def vae_forward(x, eps, padded_params, *, features_dim, tile_n=1024):
    """x: (batch, word_len, 69) f32; eps: (batch*word_len, features_dim) f32."""
    batch, word_len, enc_dim = x.shape
    assert enc_dim == ENC_DIM
    assert features_dim <= HALF
    n = batch * word_len

    # Row tiling (bf16 blocks need 16-sublane multiples):
    #  * large n : 1024-row tiles amortize per-grid-step overhead and keep the MXU
    #              streaming between the serial layer-to-layer dependencies.
    #  * small n : split into >= 2 tiles so the v7x megacore uses both TensorCores
    #              (harmless one extra tiny tile on single-TC v5e/v6e).
    if n <= tile_n:
        tile_n = max(16, _round_up(pl.cdiv(n, 2), 16))
        num_tiles = max(2, pl.cdiv(n, tile_n))
    else:
        tile_n = _round_up(tile_n, 16)
        num_tiles = pl.cdiv(n, tile_n)
    n_pad = num_tiles * tile_n

    # Pad rows to a tile multiple and features to the 128-lane width (directly in bf16:
    # no f32 staging array / extra cast pass outside the kernel).
    x_flat = x.reshape(n, enc_dim).astype(jnp.bfloat16)
    x_pad = jnp.zeros((n_pad, LANE), jnp.bfloat16).at[:n, :enc_dim].set(x_flat)
    eps_pad = jnp.zeros((n_pad, LANE), jnp.bfloat16).at[:n, :features_dim].set(
        eps.astype(jnp.bfloat16))

    row_spec = lambda width: pl.BlockSpec((tile_n, width), lambda i: (i, 0))
    full_spec = lambda a: pl.BlockSpec(a.shape, lambda i: (0, 0))   # grid-invariant

    inputs = (x_pad, eps_pad) + tuple(padded_params)
    in_specs = [row_spec(LANE), row_spec(LANE)] + [full_spec(p) for p in padded_params]

    flops = 2 * n_pad * LANE * (6 * LANE)                 # 6x 128x128 dots per row tile
    bytes_accessed = (x_pad.size * 2 + eps_pad.size * 2 + n_pad * 2 * LANE * 2
                      + sum(int(p.size) * p.dtype.itemsize for p in padded_params))

    out = pl.pallas_call(
        vae_kernel,
        grid=(num_tiles,),
        in_specs=in_specs,
        out_specs=pl.BlockSpec((tile_n, 2 * LANE), lambda i: (i, 0)),
        out_shape=jax.ShapeDtypeStruct((n_pad, 2 * LANE), jnp.bfloat16),
        compiler_params=pltpu.CompilerParams(
            dimension_semantics=("parallel",),
            vmem_limit_bytes=32 * 1024 * 1024,   # generation-safe (v7x has 64 MiB/TC)
        ),
        cost_estimate=pl.CostEstimate(
            flops=int(flops),
            transcendentals=int(n_pad * LANE),
            bytes_accessed=int(bytes_accessed),
        ),
    )(*inputs)

    # Slice padding off and upcast to the module's f32 interface
    # (values are bf16-precision by construction).
    rec = out[:n, :ENC_DIM].astype(jnp.float32).reshape(batch, word_len, ENC_DIM)
    mu = out[:n, LANE:LANE + features_dim].astype(jnp.float32)
    log_var = out[:n, LANE + HALF:LANE + HALF + features_dim].astype(jnp.float32)
    return rec, mu, log_var


# --------------------------------------------------------------------------- #
# Pure-JAX reference (same bf16-at-dot-boundaries recipe) for a sanity check
# --------------------------------------------------------------------------- #
def vae_reference(x, eps, params, features_dim):
    bf16, f32 = jnp.bfloat16, jnp.float32

    def lin(a, wb):
        w, b = wb
        return jnp.dot(a.astype(bf16), w.astype(bf16), preferred_element_type=f32) + b

    batch, word_len, _ = x.shape
    a = x.reshape(batch * word_len, ENC_DIM)
    a = jnp.maximum(lin(a, params["enc1"]), 0.0)
    a = jnp.maximum(lin(a, params["enc2"]), 0.0)
    head = lin(a, params["enc3"])
    mu, lv = head[:, :features_dim], head[:, features_dim:]
    eps_q = eps.astype(bf16).astype(f32)          # kernel consumes bf16 noise
    z = mu + eps_q * jnp.exp(0.5 * lv)
    d = jnp.maximum(lin(z, params["dec1"]), 0.0)
    d = jnp.maximum(lin(d, params["dec2"]), 0.0)
    rec = lin(d, params["dec3"]).reshape(batch, word_len, ENC_DIM)
    return rec, mu, lv


if __name__ == "__main__":
    batch, word_len = 2, 8
    features_dim = 16
    embed_dim = 8  # unused by the module's forward; kept for signature parity

    key = jax.random.PRNGKey(0)
    k_x, k_eps, k_params = jax.random.split(key, 3)

    x = jax.random.normal(k_x, (batch, word_len, ENC_DIM), jnp.float32)
    # TODO(synk): torch.randn_like noise is generated host-side with jax.random and
    # passed in (in-kernel pltpu.prng_* Box-Muller would break parity with host noise).
    eps = jax.random.normal(k_eps, (batch * word_len, features_dim), jnp.float32)

    params = make_params(k_params, features_dim)
    padded = prepare_padded_params(params, features_dim)

    rec, mu, log_var = jax.block_until_ready(
        vae_forward(x, eps, padded, features_dim=features_dim)
    )

    assert rec.shape == (batch, word_len, ENC_DIM)
    assert mu.shape == (batch * word_len, features_dim)
    assert log_var.shape == (batch * word_len, features_dim)

    rec_r, mu_r, lv_r = vae_reference(x, eps, params, features_dim)
    assert bool(jnp.all(jnp.isfinite(rec)))
    assert bool(jnp.allclose(rec, rec_r, atol=2e-2, rtol=2e-2))
    assert bool(jnp.allclose(mu, mu_r, atol=2e-2, rtol=2e-2))
    assert bool(jnp.allclose(log_var, lv_r, atol=2e-2, rtol=2e-2))

    print("KERNEL_OK")
</pallas_src>

<mosaic_0001>
module attributes {stable_mosaic.version = 11 : i64} {
  func.func @vae_kernel(%arg0: i32, %arg1: memref<16x128xbf16, #tpu.memory_space<vmem>>, %arg2: memref<16x128xbf16, #tpu.memory_space<vmem>>, %arg3: memref<128x128xbf16, #tpu.memory_space<vmem>>, %arg4: memref<1x128xf32, #tpu.memory_space<vmem>>, %arg5: memref<128x128xbf16, #tpu.memory_space<vmem>>, %arg6: memref<1x128xf32, #tpu.memory_space<vmem>>, %arg7: memref<128x128xbf16, #tpu.memory_space<vmem>>, %arg8: memref<1x128xf32, #tpu.memory_space<vmem>>, %arg9: memref<128x128xbf16, #tpu.memory_space<vmem>>, %arg10: memref<1x128xf32, #tpu.memory_space<vmem>>, %arg11: memref<128x128xbf16, #tpu.memory_space<vmem>>, %arg12: memref<1x128xf32, #tpu.memory_space<vmem>>, %arg13: memref<128x128xbf16, #tpu.memory_space<vmem>>, %arg14: memref<1x128xf32, #tpu.memory_space<vmem>>, %arg15: memref<16x256xbf16, #tpu.memory_space<vmem>>) attributes {dimension_semantics = [#tpu.dimension_semantics<parallel>], iteration_bounds = array<i64: 2>, scalar_prefetch = 0 : i64, scratch_operands = 0 : i64, tpu.core_type = #tpu.core_type<tc>, window_params = [{transform_indices = @transform_0, window_bounds = array<i64: 16, 128>}, {transform_indices = @transform_1, window_bounds = array<i64: 16, 128>}, {pipeline_mode = #tpu.pipeline_mode<synchronous>, transform_indices = @transform_2, window_bounds = array<i64: 128, 128>}, {pipeline_mode = #tpu.pipeline_mode<synchronous>, transform_indices = @transform_3, window_bounds = array<i64: 1, 128>}, {pipeline_mode = #tpu.pipeline_mode<synchronous>, transform_indices = @transform_4, window_bounds = array<i64: 128, 128>}, {pipeline_mode = #tpu.pipeline_mode<synchronous>, transform_indices = @transform_5, window_bounds = array<i64: 1, 128>}, {pipeline_mode = #tpu.pipeline_mode<synchronous>, transform_indices = @transform_6, window_bounds = array<i64: 128, 128>}, {pipeline_mode = #tpu.pipeline_mode<synchronous>, transform_indices = @transform_7, window_bounds = array<i64: 1, 128>}, {pipeline_mode = #tpu.pipeline_mode<synchronous>, transform_indices = @transform_8, window_bounds = array<i64: 128, 128>}, {pipeline_mode = #tpu.pipeline_mode<synchronous>, transform_indices = @transform_9, window_bounds = array<i64: 1, 128>}, {pipeline_mode = #tpu.pipeline_mode<synchronous>, transform_indices = @transform_10, window_bounds = array<i64: 128, 128>}, {pipeline_mode = #tpu.pipeline_mode<synchronous>, transform_indices = @transform_11, window_bounds = array<i64: 1, 128>}, {pipeline_mode = #tpu.pipeline_mode<synchronous>, transform_indices = @transform_12, window_bounds = array<i64: 128, 128>}, {pipeline_mode = #tpu.pipeline_mode<synchronous>, transform_indices = @transform_13, window_bounds = array<i64: 1, 128>}, {transform_indices = @transform_14, window_bounds = array<i64: 16, 256>}]} {
    %c0 = arith.constant 0 : index
    %c0_0 = arith.constant 0 : index
    %0 = vector.load %arg1[%c0, %c0_0] : memref<16x128xbf16, #tpu.memory_space<vmem>>, vector<16x128xbf16>
    %c0_1 = arith.constant 0 : index
    %c0_2 = arith.constant 0 : index
    %1 = vector.load %arg3[%c0_1, %c0_2] : memref<128x128xbf16, #tpu.memory_space<vmem>>, vector<128x128xbf16>
    %cst = arith.constant dense<0.000000e+00> : vector<16x128xf32>
    %2 = tpu.matmul %0, %1, %cst {dimension_numbers = #tpu.dot_dimension_numbers<[1], [0], [0], [1], [0, 0, 1, 1], [], []>} : vector<16x128xbf16>, vector<128x128xbf16>, vector<16x128xf32> -> vector<16x128xf32>
    %c0_3 = arith.constant 0 : index
    %c0_4 = arith.constant 0 : index
    %3 = vector.load %arg4[%c0_3, %c0_4] : memref<1x128xf32, #tpu.memory_space<vmem>>, vector<1x128xf32>
    %4 = vector.broadcast %3 : vector<1x128xf32> to vector<16x128xf32>
    %5 = arith.addf %2, %4 : vector<16x128xf32>
    %cst_5 = arith.constant 0.000000e+00 : f32
    %6 = vector.broadcast %cst_5 : f32 to vector<16x128xf32>
    %7 = arith.maximumf %5, %6 : vector<16x128xf32>
    %8 = arith.truncf %7 : vector<16x128xf32> to vector<16x128xbf16>
    %c0_6 = arith.constant 0 : index
    %c0_7 = arith.constant 0 : index
    %9 = vector.load %arg5[%c0_6, %c0_7] : memref<128x128xbf16, #tpu.memory_space<vmem>>, vector<128x128xbf16>
    %cst_8 = arith.constant dense<0.000000e+00> : vector<16x128xf32>
    %10 = tpu.matmul %8, %9, %cst_8 {dimension_numbers = #tpu.dot_dimension_numbers<[1], [0], [0], [1], [0, 0, 1, 1], [], []>} : vector<16x128xbf16>, vector<128x128xbf16>, vector<16x128xf32> -> vector<16x128xf32>
    %c0_9 = arith.constant 0 : index
    %c0_10 = arith.constant 0 : index
    %11 = vector.load %arg6[%c0_9, %c0_10] : memref<1x128xf32, #tpu.memory_space<vmem>>, vector<1x128xf32>
    %12 = vector.broadcast %11 : vector<1x128xf32> to vector<16x128xf32>
    %13 = arith.addf %10, %12 : vector<16x128xf32>
    %cst_11 = arith.constant 0.000000e+00 : f32
    %14 = vector.broadcast %cst_11 : f32 to vector<16x128xf32>
    %15 = arith.maximumf %13, %14 : vector<16x128xf32>
    %16 = arith.truncf %15 : vector<16x128xf32> to vector<16x128xbf16>
    %c0_12 = arith.constant 0 : index
    %c0_13 = arith.constant 0 : index
    %17 = vector.load %arg7[%c0_12, %c0_13] : memref<128x128xbf16, #tpu.memory_space<vmem>>, vector<128x128xbf16>
    %cst_14 = arith.constant dense<0.000000e+00> : vector<16x128xf32>
    %18 = tpu.matmul %16, %17, %cst_14 {dimension_numbers = #tpu.dot_dimension_numbers<[1], [0], [0], [1], [0, 0, 1, 1], [], []>} : vector<16x128xbf16>, vector<128x128xbf16>, vector<16x128xf32> -> vector<16x128xf32>
    %c0_15 = arith.constant 0 : index
    %c0_16 = arith.constant 0 : index
    %19 = vector.load %arg8[%c0_15, %c0_16] : memref<1x128xf32, #tpu.memory_space<vmem>>, vector<1x128xf32>
    %20 = vector.broadcast %19 : vector<1x128xf32> to vector<16x128xf32>
    %21 = arith.addf %18, %20 : vector<16x128xf32>
    %c64_i32 = arith.constant 64 : i32
    %22 = tpu.dynamic_rotate %21 by %c64_i32 dim 1 : vector<16x128xf32>, i32 -> vector<16x128xf32>
    %c0_17 = arith.constant 0 : index
    %c0_18 = arith.constant 0 : index
    %23 = vector.load %arg2[%c0_17, %c0_18] : memref<16x128xbf16, #tpu.memory_space<vmem>>, vector<16x128xbf16>
    %24 = arith.extf %23 : vector<16x128xbf16> to vector<16x128xf32>
    %cst_19 = arith.constant 5.000000e-01 : f32
    %25 = vector.broadcast %cst_19 : f32 to vector<16x128xf32>
    %26 = arith.mulf %25, %22 : vector<16x128xf32>
    %27 = math.exp %26 : vector<16x128xf32>
    %28 = arith.mulf %24, %27 : vector<16x128xf32>
    %29 = arith.addf %21, %28 : vector<16x128xf32>
    %30 = arith.truncf %29 : vector<16x128xf32> to vector<16x128xbf16>
    %c0_20 = arith.constant 0 : index
    %c0_21 = arith.constant 0 : index
    %31 = vector.load %arg9[%c0_20, %c0_21] : memref<128x128xbf16, #tpu.memory_space<vmem>>, vector<128x128xbf16>
    %cst_22 = arith.constant dense<0.000000e+00> : vector<16x128xf32>
    %32 = tpu.matmul %30, %31, %cst_22 {dimension_numbers = #tpu.dot_dimension_numbers<[1], [0], [0], [1], [0, 0, 1, 1], [], []>} : vector<16x128xbf16>, vector<128x128xbf16>, vector<16x128xf32> -> vector<16x128xf32>
    %c0_23 = arith.constant 0 : index
    %c0_24 = arith.constant 0 : index
    %33 = vector.load %arg10[%c0_23, %c0_24] : memref<1x128xf32, #tpu.memory_space<vmem>>, vector<1x128xf32>
    %34 = vector.broadcast %33 : vector<1x128xf32> to vector<16x128xf32>
    %35 = arith.addf %32, %34 : vector<16x128xf32>
    %cst_25 = arith.constant 0.000000e+00 : f32
    %36 = vector.broadcast %cst_25 : f32 to vector<16x128xf32>
    %37 = arith.maximumf %35, %36 : vector<16x128xf32>
    %38 = arith.truncf %37 : vector<16x128xf32> to vector<16x128xbf16>
    %c0_26 = arith.constant 0 : index
    %c0_27 = arith.constant 0 : index
    %39 = vector.load %arg11[%c0_26, %c0_27] : memref<128x128xbf16, #tpu.memory_space<vmem>>, vector<128x128xbf16>
    %cst_28 = arith.constant dense<0.000000e+00> : vector<16x128xf32>
    %40 = tpu.matmul %38, %39, %cst_28 {dimension_numbers = #tpu.dot_dimension_numbers<[1], [0], [0], [1], [0, 0, 1, 1], [], []>} : vector<16x128xbf16>, vector<128x128xbf16>, vector<16x128xf32> -> vector<16x128xf32>
    %c0_29 = arith.constant 0 : index
    %c0_30 = arith.constant 0 : index
    %41 = vector.load %arg12[%c0_29, %c0_30] : memref<1x128xf32, #tpu.memory_space<vmem>>, vector<1x128xf32>
    %42 = vector.broadcast %41 : vector<1x128xf32> to vector<16x128xf32>
    %43 = arith.addf %40, %42 : vector<16x128xf32>
    %cst_31 = arith.constant 0.000000e+00 : f32
    %44 = vector.broadcast %cst_31 : f32 to vector<16x128xf32>
    %45 = arith.maximumf %43, %44 : vector<16x128xf32>
    %46 = arith.truncf %45 : vector<16x128xf32> to vector<16x128xbf16>
    %c0_32 = arith.constant 0 : index
    %c0_33 = arith.constant 0 : index
    %47 = vector.load %arg13[%c0_32, %c0_33] : memref<128x128xbf16, #tpu.memory_space<vmem>>, vector<128x128xbf16>
    %cst_34 = arith.constant dense<0.000000e+00> : vector<16x128xf32>
    %48 = tpu.matmul %46, %47, %cst_34 {dimension_numbers = #tpu.dot_dimension_numbers<[1], [0], [0], [1], [0, 0, 1, 1], [], []>} : vector<16x128xbf16>, vector<128x128xbf16>, vector<16x128xf32> -> vector<16x128xf32>
    %c0_35 = arith.constant 0 : index
    %c0_36 = arith.constant 0 : index
    %49 = vector.load %arg14[%c0_35, %c0_36] : memref<1x128xf32, #tpu.memory_space<vmem>>, vector<1x128xf32>
    %50 = vector.broadcast %49 : vector<1x128xf32> to vector<16x128xf32>
    %51 = arith.addf %48, %50 : vector<16x128xf32>
    %52 = arith.truncf %51 : vector<16x128xf32> to vector<16x128xbf16>
    %c0_37 = arith.constant 0 : index
    %c0_38 = arith.constant 0 : index
    %53 = vector.load %arg15[%c0_37, %c0_38] : memref<16x256xbf16, #tpu.memory_space<vmem>>, vector<16x128xbf16>
    tpu.vector_store %arg15[%c0_37, %c0_38], %52 {strides = array<i32>} : memref<16x256xbf16, #tpu.memory_space<vmem>>, vector<16x128xbf16>,
    %54 = arith.truncf %21 : vector<16x128xf32> to vector<16x128xbf16>
    %c0_39 = arith.constant 0 : index
    %c128 = arith.constant 128 : index
    %55 = vector.load %arg15[%c0_39, %c128] : memref<16x256xbf16, #tpu.memory_space<vmem>>, vector<16x128xbf16>
    tpu.vector_store %arg15[%c0_39, %c128], %54 {strides = array<i32>} : memref<16x256xbf16, #tpu.memory_space<vmem>>, vector<16x128xbf16>,
    return
  }
  func.func @transform_0(%arg0: i32) -> (i32, i32) {
    %c0_i32 = arith.constant 0 : i32
    %c0_i32_0 = arith.constant 0 : i32
    return %arg0, %c0_i32 : i32, i32
  }
  func.func @transform_1(%arg0: i32) -> (i32, i32) {
    %c0_i32 = arith.constant 0 : i32
    %c0_i32_0 = arith.constant 0 : i32
    return %arg0, %c0_i32 : i32, i32
  }
  func.func @transform_2(%arg0: i32) -> (i32, i32) {
    %c0_i32 = arith.constant 0 : i32
    %c0_i32_0 = arith.constant 0 : i32
    %c0_i32_1 = arith.constant 0 : i32
    return %c0_i32, %c0_i32_0 : i32, i32
  }
  func.func @transform_3(%arg0: i32) -> (i32, i32) {
    %c0_i32 = arith.constant 0 : i32
    %c0_i32_0 = arith.constant 0 : i32
    %c0_i32_1 = arith.constant 0 : i32
    return %c0_i32, %c0_i32_0 : i32, i32
  }
  func.func @transform_4(%arg0: i32) -> (i32, i32) {
    %c0_i32 = arith.constant 0 : i32
    %c0_i32_0 = arith.constant 0 : i32
    %c0_i32_1 = arith.constant 0 : i32
    return %c0_i32, %c0_i32_0 : i32, i32
  }
  func.func @transform_5(%arg0: i32) -> (i32, i32) {
    %c0_i32 = arith.constant 0 : i32
    %c0_i32_0 = arith.constant 0 : i32
    %c0_i32_1 = arith.constant 0 : i32
    return %c0_i32, %c0_i32_0 : i32, i32
  }
  func.func @transform_6(%arg0: i32) -> (i32, i32) {
    %c0_i32 = arith.constant 0 : i32
    %c0_i32_0 = arith.constant 0 : i32
    %c0_i32_1 = arith.constant 0 : i32
    return %c0_i32, %c0_i32_0 : i32, i32
  }
  func.func @transform_7(%arg0: i32) -> (i32, i32) {
    %c0_i32 = arith.constant 0 : i32
    %c0_i32_0 = arith.constant 0 : i32
    %c0_i32_1 = arith.constant 0 : i32
    return %c0_i32, %c0_i32_0 : i32, i32
  }
  func.func @transform_8(%arg0: i32) -> (i32, i32) {
    %c0_i32 = arith.constant 0 : i32
    %c0_i32_0 = arith.constant 0 : i32
    %c0_i32_1 = arith.constant 0 : i32
    return %c0_i32, %c0_i32_0 : i32, i32
  }
  func.func @transform_9(%arg0: i32) -> (i32, i32) {
    %c0_i32 = arith.constant 0 : i32
    %c0_i32_0 = arith.constant 0 : i32
    %c0_i32_1 = arith.constant 0 : i32
    return %c0_i32, %c0_i32_0 : i32, i32
  }
  func.func @transform_10(%arg0: i32) -> (i32, i32) {
    %c0_i32 = arith.constant 0 : i32
    %c0_i32_0 = arith.constant 0 : i32
    %c0_i32_1 = arith.constant 0 : i32
    return %c0_i32, %c0_i32_0 : i32, i32
  }
  func.func @transform_11(%arg0: i32) -> (i32, i32) {
    %c0_i32 = arith.constant 0 : i32
    %c0_i32_0 = arith.constant 0 : i32
    %c0_i32_1 = arith.constant 0 : i32
    return %c0_i32, %c0_i32_0 : i32, i32
  }
  func.func @transform_12(%arg0: i32) -> (i32, i32) {
    %c0_i32 = arith.constant 0 : i32
    %c0_i32_0 = arith.constant 0 : i32
    %c0_i32_1 = arith.constant 0 : i32
    return %c0_i32, %c0_i32_0 : i32, i32
  }
  func.func @transform_13(%arg0: i32) -> (i32, i32) {
    %c0_i32 = arith.constant 0 : i32
    %c0_i32_0 = arith.constant 0 : i32
    %c0_i32_1 = arith.constant 0 : i32
    return %c0_i32, %c0_i32_0 : i32, i32
  }
  func.func @transform_14(%arg0: i32) -> (i32, i32) {
    %c0_i32 = arith.constant 0 : i32
    %c0_i32_0 = arith.constant 0 : i32
    return %arg0, %c0_i32 : i32, i32
  }
}

</mosaic_0001>

<bundles_post_ra>
// kernel: vae_forward.1
= control target key start
LH: loop header
LB: loop body
LE: loop exit
PB: predicated region body
PF: predicated region fallthrough
CT: control target
= control target key end

     0   :  { %s1986_s0 = inlined_call_operand.vmem [shape: bf16[32,128], index: 0, kind: input, shape index: {}]   ;;  %s1987_s1 = inlined_call_operand.vmem [shape: bf16[32,128], index: 1, kind: input, shape index: {}]   ;;  %s1988_s2 = inlined_call_operand.vmem [shape: bf16[128,128], index: 2, kind: input, shape index: {}]   ;;  %s1989_s3 = inlined_call_operand.vmem [shape: f32[1,128], index: 3, kind: input, shape index: {}]   ;;  %s1990_s4 = inlined_call_operand.hbm [shape: bf16[128,128], index: 4, kind: input, shape index: {}]   ;;  %s1991_s5 = inlined_call_operand.vmem [shape: f32[1,128], index: 5, kind: input, shape index: {}]   ;;  %s1992_s6 = inlined_call_operand.hbm [shape: bf16[128,128], index: 6, kind: input, shape index: {}]   ;;  %s1993_s7 = inlined_call_operand.vmem [shape: f32[1,128], index: 7, kind: input, shape index: {}]   ;;  %s1994_s8 = inlined_call_operand.hbm [shape: bf16[128,128], index: 8, kind: input, shape index: {}]   ;;  %s1995_s9 = inlined_call_operand.vmem [shape: f32[1,128], index: 9, kind: input, shape index: {}]   ;;  %s1996_s10 = inlined_call_operand.hbm [shape: bf16[128,128], index: 10, kind: input, shape index: {}]   ;;  %s1997_s11 = inlined_call_operand.vmem [shape: f32[1,128], index: 11, kind: input, shape index: {}]   ;;  %s1998_s12 = inlined_call_operand.hbm [shape: bf16[128,128], index: 12, kind: input, shape index: {}]   ;;  %s1999_s13 = inlined_call_operand.vmem [shape: f32[1,128], index: 13, kind: input, shape index: {}]   ;;  %s2000_s14 = inlined_call_operand.vmem [shape: bf16[32,256], index: 14, kind: output, shape index: {}]  }
   0x1   :  { %2002 = sst [smem:[#allocation13_spill]] %s1990_s4 }
   0x2   :  { %2003 = sst [smem:[#allocation14_spill]] %s1992_s6 }
   0x3   :  { %2004 = sst [smem:[#allocation15_spill]] %s1996_s10 }
   0x4   :  { %2005 = sst [smem:[#allocation16_spill]] %s2000_s14 }
   0x5   :  { %19 = vsyncpa [#allocation3], 0 }
   0x6   :  { %20 = vsyncpa [#allocation5], 0 }
   0x7   :  { %21 = vsyncpa [#allocation8], 0  ;;  %s1847_s29 = smov 0  }
   0x8 LB: > { %s2001_s30 = sadd.s32 4294967295, %s1762_s29   ;;  %p1239_p0 = scmp.ge.s32.totalorder %s1762_s29, 1  ;;  %s1762_s29 = sphi %s1847_s29, %s27_s29  }
   0x9   : > { %p362_p1 = scmp.lt.s32.totalorder %s1762_s29, 3  ;;  %p1857_p2 = scmp.eq.s32.totalorder %s2001_s30, 0 }
   0xa   : > { %s2007_s6 = sld [smem:[#allocation14_spill]]  ;;  %s1764_s23 = smov [#allocation4]  }
   0xb   : > { %p1864_p3 = pnand %p1239_p0, %p362_p1  ;;  %s2009_s10 = sld [smem:[#allocation15_spill]] }
   0xc   : > { %s398_s24 = sshll.u32 %s1764_s23, 4  ;;  %s1765_s26 = smov [#allocation7]   ;;  %s399_s24 = int_to_ptr.vmem [resolvable:$true] %s398_s24 }
   0xd   : > { %p1542_p4 = pneg %p1864_p3  ;;  %s432_s27 = sshll.u32 %s1765_s26, 4  ;;  %s433_s27 = int_to_ptr.vmem [resolvable:$true] %s432_s27 }
   0xe   : > { %s2011_s4 = sld [smem:[#allocation13_spill]]  ;;  %s1766_s20 = smov 64  }
   0xf   : > { %p1875_p5 = pnand %p1857_p2, %p1542_p4  ;;  %s1767_s21 = smov 4  }
  0x10   : > { %s396_s18 = sshll.u32 %s2007_s6, 4  ;;  %s1768_s23 = smov [#allocation2]   ;;  %s397_s18 = int_to_ptr.hbm [resolvable:$true] %s396_s18 }
  0x11   : > { %s430_s22 = sshll.u32 %s2009_s10, 4  ;;  %s381_s30 = sshll.u32 %s1768_s23, 4  ;;  %s431_s22 = int_to_ptr.hbm [resolvable:$true] %s430_s22  ;;  %s382_s30 = int_to_ptr.vmem [resolvable:$true] %s381_s30 }
  0x12   : > { %1548 = dma.hbm_to_vmem [thread:$0]  (!%p1875_p5), %s397_s18, 1024, %s399_s24, [#allocation5], %s1766_s20, %s1766_s20, %s1767_s21  }
  0x13   : > { %1554 = dma.hbm_to_vmem [thread:$0]  (!%p1875_p5), %s431_s22, 1024, %s433_s27, [#allocation8], %s1766_s20, %s1766_s20, %s1767_s21  }
  0x14   : > { %s379_s17 = sshll.u32 %s2011_s4, 4  ;;  %s413_s26 = sshll.u32 %s1994_s8, 4  ;;  %s380_s17 = int_to_ptr.hbm [resolvable:$true] %s379_s17  ;;  %s414_s26 = int_to_ptr.hbm [resolvable:$true] %s413_s26 }
  0x15   : > { %1545 = dma.hbm_to_vmem [thread:$0]  (!%p1875_p5), %s380_s17, 1024, %s382_s30, [#allocation3], %s1766_s20, %s1766_s20, %s1767_s21  }
  0x16   : > { %s447_s4 = sshll.u32 %s1998_s12, 4  ;;  %s1769_s14 = smov [#allocation6]   ;;  %s448_s4 = int_to_ptr.hbm [resolvable:$true] %s447_s4 }
  0x17   : > { %s415_s18 = sshll.u32 %s1769_s14, 4  ;;  %s1770_s22 = smov [#allocation9]   ;;  %s416_s18 = int_to_ptr.vmem [resolvable:$true] %s415_s18 }
  0x18   : > { %1551 = dma.hbm_to_vmem [thread:$0]  (!%p1875_p5), %s414_s26, 1024, %s416_s18, [#allocation5], %s1766_s20, %s1766_s20, %s1767_s21  }
  0x19   : > { %s449_s24 = sshll.u32 %s1770_s22, 4  ;;  %486 = sbr.rel (%p1864_p3) target bundleno = 1046 (0x416), region = 76  ;;  %s450_s24 = int_to_ptr.vmem [resolvable:$true] %s449_s24 }
  0x1a   : > { %1557 = dma.hbm_to_vmem [thread:$0]  (!%p1875_p5), %s448_s4, 1024, %s450_s24, [#allocation8], %s1766_s20, %s1766_s20, %s1767_s21  }
  0x1e   : > { %1749 = dma.done.wait (%p1857_p2), [#allocation3], 1024  }
  0x1f   : > { %1751 = vsyncadd (%p1857_p2), [#allocation3], 4294966272 }
  0x20   : > { %1753 = dma.done.wait (%p1857_p2), [#allocation5], 2048  }
  0x21   : > { %1755 = vsyncadd (%p1857_p2), [#allocation5], 4294965248 }
  0x22   : > { %1757 = dma.done.wait (%p1857_p2), [#allocation8], 2048  }
  0x23   : > { %1759 = vsyncadd (%p1857_p2), [#allocation8], 4294965248  ;;  %v1466_v0 = vld [vmem:[%s1988_s2 + $0x38] sm:$0xff]  ;;  %v1465_v1 = vld [vmem:[%s1988_s2 + $0x30] sm:$0xff]  ;;  %s2012_s27 = sadd.s32 4294967295, %s1762_s29   ;;  %s1771_s20 = smov 64  }
  0x24   : > { %654 = vmatpush.bf16.msra.mxu0 %v1466_v0  ;;  %v1474_v2 = vld [vmem:[#allocation2 + $0x38] sm:$0xff]  ;;  %v1464_v3 = vld [vmem:[%s1988_s2 + $0x28] sm:$0xff]  ;;  %v1473_v4 = vld [vmem:[#allocation2 + $0x30] sm:$0xff]  ;;  %s1252_s17 = sshll.u32 %s2012_s27, 1  ;;  %s2013_s30 = sld [smem:[#allocation16_spill]] }
  0x25   : > { %739 = vmatpush.bf16.msra.mxu1 %v1474_v2  ;;  %v1472_v5 = vld [vmem:[#allocation2 + $0x28] sm:$0xff]  ;;  %v1463_v6 = vld [vmem:[%s1988_s2 + $0x20] sm:$0xff]  ;;  %v1462_v8 = vld [vmem:[%s1988_s2 + $0x18] sm:$0xff]  ;;  %p560_p6 = scmp.lt.s32.totalorder %s1252_s17, 3 }
  0x26   : > { %v1471_v7 = vld [vmem:[#allocation2 + $0x20] sm:$0xff]  ;;  %v1461_v9 = vld [vmem:[%s1988_s2 + $0x10] sm:$0xff]  ;;  %v1460_v10 = vld [vmem:[%s1988_s2 + $0x8] sm:$0xff] }
  0x27   : > { %s2015_s17 = smov (!%p560_p6, %s1252_s17), 3  ;;  %v1459_v11 = vld [vmem:[%s1988_s2] sm:$0xff]  ;;  %v1470_v13 = vld [vmem:[#allocation2 + $0x18] sm:$0xff]  ;;  %v1469_v14 = vld [vmem:[#allocation2 + $0x10] sm:$0xff] }
  0x28   : > { %655 = vmatpush.bf16.msra.mxu0 %v1465_v1  ;;  %s1253_s18 = sshll.u32 %s2015_s17, 2  ;;  %v1468_v15 = vld [vmem:[#allocation2 + $0x8] sm:$0xff]  ;;  %v1467_v16 = vld [vmem:[#allocation2] sm:$0xff]  ;;  %v1482_v17 = vld [vmem:[#allocation4 + $0x38] sm:$0xff]  ;;  %s1457_s6 = sshll.u32 %s2015_s17, 3 }
  0x29   : > { %740 = vmatpush.bf16.msra.mxu1 %v1473_v4  ;;  %s563_s10 = scalar_lea.vmem %s1986_s0, %s1253_s18  ;;  %824 = vmatpush.bf16.msra.mxu2 %v1482_v17  ;;  %v1481_v18 = vld [vmem:[#allocation4 + $0x30] sm:$0xff]  ;;  %v1480_v19 = vld [vmem:[#allocation4 + $0x28] sm:$0xff]  ;;  %v1479_v20 = vld [vmem:[#allocation4 + $0x20] sm:$0xff]  ;;  %s569_s26 = scalar_lea.vmem %s1987_s1, %s1253_s18 }
  0x2a   : > { %v1458_v12 = vld [vmem:[%s563_s10] sm:$0xff]  ;;  %v1478_v29 = vld [vmem:[#allocation4 + $0x18] sm:$0xff]  ;;  %v1477_v30 = vld [vmem:[#allocation4 + $0x10] sm:$0xff]  ;;  %s576_s19 = scalar_lea.vmem %s2013_s30, %s1457_s6 }
  0x2b   : > { %v1584_v22 = vld [vmem:[%s1989_s3] ss:$0 sm:$0xff]  ;;  %v1476_v31 = vld [vmem:[#allocation4 + $0x8] sm:$0xff]  ;;  %v1490_v41 = vld [vmem:[#allocation6 + $0x38] sm:$0xff] }
  0x2c   : > { %656 = vmatpush.bf16.msra.mxu0 %v1464_v3  ;;  %v1475_v32 = vld [vmem:[#allocation4] sm:$0xff]  ;;  %925 = vmatpush.bf16.msra.mxu3 %v1490_v41  ;;  %v1489_v42 = vld [vmem:[#allocation6 + $0x30] sm:$0xff]  ;;  %v1488_v48 = vld [vmem:[#allocation6 + $0x28] sm:$0xff] }
  0x2d   : > { %741 = vmatpush.bf16.msra.mxu1 %v1472_v5  ;;  %825 = vmatpush.bf16.msra.mxu2 %v1481_v18  ;;  %v1585_v34 = vld [vmem:[%s1991_s5] ss:$0 sm:$0xff]  ;;  %v1486_v50 = vld [vmem:[#allocation6 + $0x18] sm:$0xff]  ;;  %v1485_v51 = vld [vmem:[#allocation6 + $0x10] sm:$0xff] }
  0x2e   : > { %v1586_v43 = vld [vmem:[%s1993_s7] ss:$0 sm:$0xff]  ;;  %v1484_v52 = vld [vmem:[#allocation6 + $0x8] sm:$0xff]  ;;  %v1498_v54 = vld [vmem:[#allocation7 + $0x38] sm:$0xff] }
  0x2f   : > { %v1487_v49 = vld [vmem:[#allocation6 + $0x20] sm:$0xff]  ;;  %v1497_v55 = vld [vmem:[#allocation7 + $0x30] sm:$0xff]  ;;  %v1496_v57 = vld [vmem:[#allocation7 + $0x28] sm:$0xff] }
  0x30   : > { %657 = vmatpush.bf16.msra.mxu0 %v1463_v6  ;;  %926 = vmatpush.bf16.msra.mxu3 %v1489_v42  ;;  %v1483_v53 = vld [vmem:[#allocation6] sm:$0xff] }
  0x31   : > { %742 = vmatpush.bf16.msra.mxu1 %v1471_v7  ;;  %826 = vmatpush.bf16.msra.mxu2 %v1480_v19  ;;  %v1495_v59 = vld [vmem:[#allocation7 + $0x20] sm:$0xff] }
  0x32   : > { %v1508_v63 = vld [vmem:[%s569_s26] sm:$0xff]  }
  0x33   : > { %v1509_v1 = vunpack.c.l.bf16 %v1508_v63  ;;  %v1510_v3 = vunpack.c.h.bf16 %v1508_v63  ;;  %v1503_v17 = vld [vmem:[#allocation9 + $0x20] sm:$0xff] }
  0x34   : > { %658 = vmatpush.bf16.msra.mxu0 %v1462_v8  ;;  %927 = vmatpush.bf16.msra.mxu3 %v1488_v48  ;;  %v1587_v19 = vld [vmem:[%s1995_s9] ss:$0 sm:$0xff] }
  0x35   : > { %743 = vmatpush.bf16.msra.mxu1 %v1470_v13  ;;  %827 = vmatpush.bf16.msra.mxu2 %v1479_v20  ;;  %v1491_v13 = vld [vmem:[#allocation7] sm:$0xff] }
  0x38   : > { %659 = vmatpush.bf16.msra.mxu0 %v1461_v9  ;;  %928 = vmatpush.bf16.msra.mxu3 %v1487_v49 }
  0x39   : > { %744 = vmatpush.bf16.msra.mxu1 %v1469_v14  ;;  %828 = vmatpush.bf16.msra.mxu2 %v1478_v29  ;;  %v1506_v14 = vld [vmem:[#allocation9 + $0x38] sm:$0xff]  ;;  %v1499_v29 = vld [vmem:[#allocation9] sm:$0xff] }
  0x3c   : > { %660 = vmatpush.bf16.msra.mxu0 %v1460_v10  ;;  %929 = vmatpush.bf16.msra.mxu3 %v1486_v50  ;;  %v1494_v10 = vld [vmem:[#allocation7 + $0x18] sm:$0xff] }
  0x3d   : > { %745 = vmatpush.bf16.msra.mxu1 %v1468_v15  ;;  %829 = vmatpush.bf16.msra.mxu2 %v1477_v30  ;;  %v1505_v15 = vld [vmem:[#allocation9 + $0x30] sm:$0xff] }
  0x40   : > { %661 = vmatpush.bf16.msra.mxu0 %v1459_v11  ;;  %930 = vmatpush.bf16.msra.mxu3 %v1485_v51  ;;  %v1493_v11 = vld [vmem:[#allocation7 + $0x10] sm:$0xff] }
  0x41   : > { %746 = vmatpush.bf16.msra.mxu1 %v1467_v16  ;;  %830 = vmatpush.bf16.msra.mxu2 %v1476_v31  ;;  %v1504_v16 = vld [vmem:[#allocation9 + $0x28] sm:$0xff]  ;;  %v1588_v31 = vld [vmem:[%s1997_s11] ss:$0 sm:$0xff] }
  0x43   : > { %662 = vmatmul.bf16.vlgmr.msra.gmra.mxu0 %v1458_v12  ;;  %v1492_v12 = vld [vmem:[#allocation7 + $0x8] sm:$0xff] }
  0x44   : > { %931 = vmatpush.bf16.msra.mxu3 %v1484_v52  ;;  %1010 = vmatpush.bf16.msrb.mxu0 %v1498_v54 }
  0x45   : > { %831 = vmatpush.bf16.msra.mxu2 %v1475_v32  ;;  %1095 = vmatpush.bf16.msrb.mxu1 %v1506_v14 }
  0x48   : > { %932 = vmatpush.bf16.msra.mxu3 %v1483_v53  ;;  %1011 = vmatpush.bf16.msrb.mxu0 %v1497_v55 }
  0x49   : > { %1096 = vmatpush.bf16.msrb.mxu1 %v1505_v15 }
  0x4c   : > { %1012 = vmatpush.bf16.msrb.mxu0 %v1496_v57 }
  0x4d   : > { %1097 = vmatpush.bf16.msrb.mxu1 %v1504_v16 }
  0x50   : > { %1013 = vmatpush.bf16.msrb.mxu0 %v1495_v59 }
  0x51   : > { %1098 = vmatpush.bf16.msrb.mxu1 %v1503_v17 }
  0x54   : > { %1014 = vmatpush.bf16.msrb.mxu0 %v1494_v10 }
  0x58   : > { %1015 = vmatpush.bf16.msrb.mxu0 %v1493_v11 }
  0x5c   : > { %1016 = vmatpush.bf16.msrb.mxu0 %v1492_v12 }
  0x60   : > { %1017 = vmatpush.bf16.msrb.mxu0 %v1491_v13 }
  0xc0   : > { %v663_v21 = vpop.f32.mrf.mxu0 }
  0xc1   : > { %v664_v23 = vadd.f32 %v1584_v22, %v663_v21 }
  0xc3   : > { %v668_v26 = vmax.f32 %v664_v23, 0.0 }
  0xc8   : > { %v665_v24 = vpop.f32.mrf.mxu0 }
  0xc9   : > { %v666_v25 = vadd.f32 %v1584_v22, %v665_v24 }
  0xcb   : > { %v669_v27 = vmax.f32 %v666_v25, 0.0 }
  0xcd   : > { %v670_v28 = vpack.c.bf16 %v669_v27, %v668_v26  ;;  %v1502_v26 = vld [vmem:[#allocation9 + $0x18] sm:$0xff]  ;;  %v1501_v27 = vld [vmem:[#allocation9 + $0x10] sm:$0xff] }
  0xce   : > { %1099 = vmatpush.bf16.msrb.mxu1 %v1502_v26 }
  0xcf   : > { %747 = vmatmul.bf16.vlgmr.msra.gmra.mxu1 %v670_v28  ;;  %v1500_v28 = vld [vmem:[#allocation9 + $0x8] sm:$0xff] }
  0xd2   : > { %1100 = vmatpush.bf16.msrb.mxu1 %v1501_v27 }
  0xd6   : > { %1101 = vmatpush.bf16.msrb.mxu1 %v1500_v28 }
  0xda   : > { %1102 = vmatpush.bf16.msrb.mxu1 %v1499_v29 }
 0x14c   : > { %v748_v33 = vpop.f32.mrf.mxu1 }
 0x14d   : > { %v749_v35 = vadd.f32 %v1585_v34, %v748_v33 }
 0x14f   : > { %v753_v38 = vmax.f32 %v749_v35, 0.0 }
 0x154   : > { %v750_v36 = vpop.f32.mrf.mxu1 }
 0x155   : > { %v751_v37 = vadd.f32 %v1585_v34, %v750_v36 }
 0x157   : > { %v754_v39 = vmax.f32 %v751_v37, 0.0 }
 0x159   : > { %v755_v40 = vpack.c.bf16 %v754_v39, %v753_v38  ;;  %v1589_v38 = vld [vmem:[%s1999_s13] ss:$0 sm:$0xff] }
 0x15b   : > { %832 = vmatmul.bf16.vlgmr.msra.gmra.mxu2 %v755_v40 }
 0x1de   : > { %v833_v44 = vpop.f32.mrf.mxu2 }
 0x1df   : > { %v1955_v45 = vadd.f32 %v1586_v43, %v833_v44 }
 0x1e1   : > { %838 = vrot.lane.b32.xlu0 %v1955_v45, %s1771_s20 }
 0x1e6   : > { %v835_v46 = vpop.f32.mrf.mxu2 }
 0x1e7   : > { %v1958_v47 = vadd.f32 %v1586_v43, %v835_v46 }
 0x1e9   : > { %840 = vrot.lane.b32.xlu0 %v1958_v47, %s1771_s20 }
 0x253   : > { %v839_v56 = vpop.permute.xlu0 %838 }
 0x254   : > { %v846_v58 = vmul.f32 0.5, %v839_v56 }
 0x256   : > { %v848_v60 = vmul.f32 1.442695, %v846_v58 }
 0x258   : > { %1590 = vpow2.f32 %v848_v60 }
 0x25b   : > { %v841_v61 = vpop.permute.xlu0 %840 }
 0x25c   : > { %v847_v62 = vmul.f32 0.5, %v841_v61 }
 0x25e   : > { %v850_v0 = vmul.f32 1.442695, %v847_v62  ;;  %v1591_v2 = vpop.eup %1590 }
 0x25f   : > { %v852_v4 = vmul.f32 %v1591_v2, %v1509_v1 }
 0x260   : > { %1592 = vpow2.f32 %v850_v0 }
 0x261   : > { %v854_v7 = vadd.f32 %v852_v4, %v1955_v45 }
 0x266   : > { %v1593_v5 = vpop.eup %1592 }
 0x267   : > { %v853_v6 = vmul.f32 %v1593_v5, %v1510_v3 }
 0x269   : > { %v855_v8 = vadd.f32 %v853_v6, %v1958_v47 }
 0x26b   : > { %v856_v9 = vpack.c.bf16 %v855_v8, %v854_v7 }
 0x26d   : > { %933 = vmatmul.bf16.vlgmr.msra.gmra.mxu3 %v856_v9 }
 0x2f0   : > { %v934_v18 = vpop.f32.mrf.mxu3 }
 0x2f1   : > { %v935_v20 = vadd.f32 %v1587_v19, %v934_v18 }
 0x2f3   : > { %v939_v23 = vmax.f32 %v935_v20, 0.0 }
 0x2f8   : > { %v936_v21 = vpop.f32.mrf.mxu3 }
 0x2f9   : > { %v937_v22 = vadd.f32 %v1587_v19, %v936_v21 }
 0x2fb   : > { %v940_v24 = vmax.f32 %v937_v22, 0.0 }
 0x2fd   : > { %v941_v25 = vpack.c.bf16 %v940_v24, %v939_v23 }
 0x2ff   : > { %1018 = vmatmul.bf16.vlgmr.msrb.gmra.mxu0 %v941_v25 }
 0x37c   : > { %v1019_v30 = vpop.f32.mrf.mxu0 }
 0x37d   : > { %v1020_v32 = vadd.f32 %v1588_v31, %v1019_v30 }
 0x37f   : > { %v1024_v35 = vmax.f32 %v1020_v32, 0.0 }
 0x384   : > { %v1021_v33 = vpop.f32.mrf.mxu0 }
 0x385   : > { %v1022_v34 = vadd.f32 %v1588_v31, %v1021_v33 }
 0x387   : > { %v1025_v36 = vmax.f32 %v1022_v34, 0.0 }
 0x389   : > { %v1026_v37 = vpack.c.bf16 %v1025_v36, %v1024_v35 }
 0x38b   : > { %1103 = vmatmul.bf16.vlgmr.msrb.gmra.mxu1 %v1026_v37 }
 0x408   : > { %v1104_v39 = vpop.f32.mrf.mxu1 }
 0x409   : > { %v1105_v40 = vadd.f32 %v1589_v38, %v1104_v39 }
 0x40b   : > { %v1514_v41 = vpack.c.bf16 %v1955_v45, %v1105_v40 }
 0x40d   : > { %1515 = vst [vmem:[%s576_s19] sm:$0xff] %v1514_v41  }
 0x410   : > { %v1106_v42 = vpop.f32.mrf.mxu1 }
 0x411   : > { %v1107_v43 = vadd.f32 %v1589_v38, %v1106_v42 }
 0x413   : > { %v1519_v44 = vpack.c.bf16 %v1958_v47, %v1107_v43 }
 0x415   : > { %1521 = vst [vmem:[%s576_s19 + $0x8] sm:$0xff] %v1519_v44  }
 0x416 PF: > { %s27_s29 = sadd.s32 1, %s1762_s29  }
 0x417   : > { %p24_p7 = scmp.ge.s32.totalorder %s27_s29, 4  }
 0x419   :  { %26 = sbr.rel (!%p24_p7) target bundleno = 8 (0x8), region = 130 }
 0x41e   :  { %1141 = vsyncpa [#allocation3], 1 }
 0x41f   :  { %1143 = vsyncpa [#allocation3 + $0x1], 1 }
 0x420   :  { %1144 = vsyncpa [#allocation5], 1 }
 0x421   :  { %1145 = vsyncpa [#allocation8], 1 }

</bundles_post_ra>
